<compile_context>
chip_gen: v6e
topology: v6e:2x2x1
jax: 0.10.0
libtpu: 0.0.40
codegen_flags: <defaults>
</compile_context>

<pallas_src>
import functools

import jax
import jax.numpy as jnp
from jax import lax
from jax.experimental import pallas as pl
from jax.experimental.pallas import tpu as pltpu


def _round_up(x, m):
    return ((x + m - 1) // m) * m


def _sublane_rows(dtype):
    itemsize = jnp.dtype(dtype).itemsize
    if itemsize == 4:
        return 8
    if itemsize == 2:
        return 16
    return 32


# -----------------------------------------------------------------------------
# Kernel
# -----------------------------------------------------------------------------
def _causal_conv(src_s, w_ref, off, dilation, K, Tt, C, rows):
    """Causal dilated conv over one (Bt, Tt) tile, channels-last.

    src_s : (Bt, pad_rows + Tt, C) VMEM scratch (causal history rows + current tile)
    w_ref : (K*C, Cout) flattened taps, rows ordered (tap, channel)
    Per-tap depth-C matmuls accumulated in f32: avoids the K*C concat slab's lane
    relayout/copy; a depth-C pass already fills the MXU at lane-aligned C.
    """
    acc = None
    for j in range(K):
        tap = src_s[:, pl.ds(off + j * dilation, Tt), :]       # (Bt, Tt, C)
        tap = tap.reshape(rows, C)                              # collapse (Bt, Tt) -> rows
        part = jnp.dot(tap, w_ref[pl.ds(j * C, C), :],
                       preferred_element_type=jnp.float32)
        acc = part if acc is None else acc + part
    return acc                                                  # (rows, Cout) f32


def _temporal_block_kernel(x_ref, w1_ref, b1_ref, w2_ref, b2_ref, *rest,
                           K, dilation, Tt, pad, pad_rows, has_downsample):
    """Fused: conv1+relu -> scratch -> conv2+relu -> (+residual) -> relu, T-tiled."""
    if has_downsample:
        wd_ref, bd_ref, o_ref, xpad_s, hpad_s = rest
    else:
        o_ref, xpad_s, hpad_s = rest

    Bt, _, Cin = x_ref.shape
    Cout = o_ref.shape[2]
    rows = Bt * Tt
    off = pad_rows - pad           # first row of the earliest (most-delayed) tap
    t_idx = pl.program_id(1)
    f32 = jnp.float32

    # Zero the causal-history rows once per batch tile (its first T step).  Gating on
    # program_id(1) == 0 (not a global first-iteration flag) stays correct on v7x
    # megacore, where each core has a private scratch and its own slice of the batch axis.
    if pad_rows > 0:
        @pl.when(t_idx == 0)
        def _init_history():
            xpad_s[:, pl.ds(0, pad_rows), :] = jnp.zeros((Bt, pad_rows, Cin), xpad_s.dtype)
            hpad_s[:, pl.ds(0, pad_rows), :] = jnp.zeros((Bt, pad_rows, Cout), hpad_s.dtype)

    # Stage the current x tile behind the history rows (sublane-aligned store).
    xv = x_ref[...]
    xpad_s[:, pl.ds(pad_rows, Tt), :] = xv

    # conv1 + chomp + relu   (dropout1 = identity in eval mode)
    h1 = _causal_conv(xpad_s, w1_ref, off, dilation, K, Tt, Cin, rows)
    h1 = jnp.maximum(h1 + b1_ref[...].astype(f32), 0.0)
    hpad_s[:, pl.ds(pad_rows, Tt), :] = h1.reshape(Bt, Tt, Cout).astype(hpad_s.dtype)

    # conv2 + chomp + relu   (dropout2 = identity in eval mode)
    out = _causal_conv(hpad_s, w2_ref, off, dilation, K, Tt, Cout, rows)
    out = jnp.maximum(out + b2_ref[...].astype(f32), 0.0)

    # residual path (1x1 downsample conv when Cin != Cout) + final relu
    x2d = xv.reshape(rows, Cin)
    if has_downsample:
        res = jnp.dot(x2d, wd_ref[...], preferred_element_type=f32) + bd_ref[...].astype(f32)
    else:
        res = x2d.astype(f32)
    y = jnp.maximum(out + res, 0.0)
    o_ref[...] = y.reshape(Bt, Tt, Cout).astype(o_ref.dtype)

    # Causal carry: keep the trailing pad_rows rows of x / h1 for the next T tile.
    # Offsets and extents are all multiples of the sublane tile -> unmasked copies.
    if pad_rows > 0:
        @pl.when(t_idx + 1 < pl.num_programs(1))
        def _carry_history():
            xpad_s[:, pl.ds(0, pad_rows), :] = xpad_s[:, pl.ds(Tt, pad_rows), :]
            hpad_s[:, pl.ds(0, pad_rows), :] = hpad_s[:, pl.ds(Tt, pad_rows), :]


# -----------------------------------------------------------------------------
# Wrapper (one fused pallas_call per TemporalBlock)
# -----------------------------------------------------------------------------
def weight_norm_effective(v, g):
    """PyTorch weight_norm(dim=0): v (Cout, Cin, K), g (Cout,) -> effective weight."""
    norm = jnp.sqrt(jnp.sum(v * v, axis=(1, 2), keepdims=True))
    return (g[:, None, None] / norm) * v


def _pick_batch_tile(B, cap=8):
    # Largest divisor of B that is <= cap while keeping grid[0] >= 2, so the "parallel"
    # batch axis can shard across v7x's two TensorCores.
    best = 1
    for bt in range(1, min(B, cap) + 1):
        if B % bt == 0 and (B // bt >= 2 or B == 1):
            best = bt
    return best


def _pick_time_tile(T, sub, pad_rows, cap=512):
    # Largest divisor of T that is a multiple of the sublane tile, >= pad_rows (so the
    # causal-carry source lies inside the current tile) and <= cap; else full T.
    best = None
    for tt in range(sub, min(T, cap) + 1, sub):
        if T % tt == 0 and tt >= pad_rows:
            best = tt
    return best if best is not None else T


def temporal_block_forward_tc(x_tc, params, kernel_size, dilation,
                              batch_tile=None, time_tile=None, compute_dtype=None):
    """Fused TemporalBlock, channels-last: x_tc (B, T, Cin) -> (B, T, Cout).

    Use this entry point between stacked blocks so only the network edges transpose."""
    B, T, Cin = x_tc.shape
    K = int(kernel_size)
    Cout = params["v1"].shape[0]
    has_downsample = "wd" in params
    if not has_downsample:
        assert Cin == Cout, "identity residual requires Cin == Cout"

    cdtype = jnp.dtype(compute_dtype) if compute_dtype is not None else jnp.dtype(x_tc.dtype)
    assert cdtype in (jnp.dtype(jnp.float32), jnp.dtype(jnp.bfloat16))
    sub = _sublane_rows(cdtype)
    pad = dilation * (K - 1)
    pad_rows = _round_up(pad, sub) if pad > 0 else 0

    # Lane-dense channel padding (multiple of 128) -> unmasked stores, full MXU lanes.
    Cin_p, Cout_p = _round_up(Cin, 128), _round_up(Cout, 128)

    # ---- plain-JAX glue on the tiny weights: weight_norm reparam + pad + flatten -------
    w1 = jnp.transpose(weight_norm_effective(params["v1"], params["g1"]), (2, 1, 0))  # (K,Cin,Cout)
    w2 = jnp.transpose(weight_norm_effective(params["v2"], params["g2"]), (2, 1, 0))  # (K,Cout,Cout)
    w1 = jnp.pad(w1, ((0, 0), (0, Cin_p - Cin), (0, Cout_p - Cout)))
    w2 = jnp.pad(w2, ((0, 0), (0, Cout_p - Cout), (0, Cout_p - Cout)))
    w1 = w1.reshape(K * Cin_p, Cout_p).astype(cdtype)
    w2 = w2.reshape(K * Cout_p, Cout_p).astype(cdtype)
    b1 = jnp.pad(params["b1"], (0, Cout_p - Cout)).reshape(1, Cout_p).astype(jnp.float32)
    b2 = jnp.pad(params["b2"], (0, Cout_p - Cout)).reshape(1, Cout_p).astype(jnp.float32)

    x_p = x_tc
    if Cin_p != Cin:
        x_p = jnp.pad(x_p, ((0, 0), (0, 0), (0, Cin_p - Cin)))
    x_p = x_p.astype(cdtype)

    # ---- tiling -------------------------------------------------------------------------
    Bt = int(batch_tile) if batch_tile is not None else _pick_batch_tile(B)
    assert B % Bt == 0
    if time_tile is not None:
        Tt = int(time_tile)
        assert T % Tt == 0
        if T // Tt > 1:
            assert Tt % sub == 0 and Tt >= pad_rows, (Tt, sub, pad_rows)
    else:
        Tt = _pick_time_tile(T, sub, pad_rows)
    grid = (B // Bt, T // Tt)

    args = [x_p, w1, b1, w2, b2]
    in_specs = [
        pl.BlockSpec((Bt, Tt, Cin_p), lambda b, t: (b, t, 0)),
        pl.BlockSpec((K * Cin_p, Cout_p), lambda b, t: (0, 0)),
        pl.BlockSpec((1, Cout_p), lambda b, t: (0, 0)),
        pl.BlockSpec((K * Cout_p, Cout_p), lambda b, t: (0, 0)),
        pl.BlockSpec((1, Cout_p), lambda b, t: (0, 0)),
    ]
    if has_downsample:
        wd = jnp.pad(jnp.transpose(params["wd"][:, :, 0], (1, 0)),
                     ((0, Cin_p - Cin), (0, Cout_p - Cout))).astype(cdtype)
        bd = jnp.pad(params["bd"], (0, Cout_p - Cout)).reshape(1, Cout_p).astype(jnp.float32)
        args += [wd, bd]
        in_specs += [
            pl.BlockSpec((Cin_p, Cout_p), lambda b, t: (0, 0)),
            pl.BlockSpec((1, Cout_p), lambda b, t: (0, 0)),
        ]

    # ---- VMEM budget + cost estimate ----------------------------------------------------
    itemsize = jnp.dtype(cdtype).itemsize
    weight_bytes = (K * Cin_p + K * Cout_p + (Cin_p if has_downsample else 0)) * Cout_p * itemsize
    est = (2 * Bt * Tt * (Cin_p + Cout_p) * itemsize             # double-buffered in/out blocks
           + Bt * (pad_rows + Tt) * (Cin_p + Cout_p) * itemsize  # causal-carry scratch
           + 2 * weight_bytes + 4 * 3 * Cout_p * 4)              # weights + biases (dbl-buffered)
    vmem_limit = int(min(max(est * 5 // 4 + (4 << 20), 32 << 20), 100 << 20))
    # TODO(synk): single-buffer the constant weight blocks (pipeline_mode=pl.Buffered(1))
    # to shave one more weight copy off VMEM on v7x.

    flops = 2 * B * T * (K * Cin_p + K * Cout_p + (Cin_p if has_downsample else 0)) * Cout_p
    bytes_accessed = B * T * (Cin_p + Cout_p) * itemsize + weight_bytes
    cost = pl.CostEstimate(flops=flops, transcendentals=0, bytes_accessed=bytes_accessed)

    kern = functools.partial(_temporal_block_kernel, K=K, dilation=dilation, Tt=Tt,
                             pad=pad, pad_rows=pad_rows, has_downsample=has_downsample)

    y_p = pl.pallas_call(
        kern,
        out_shape=jax.ShapeDtypeStruct((B, T, Cout_p), cdtype),
        grid_spec=pltpu.PrefetchScalarGridSpec(
            num_scalar_prefetch=0,
            grid=grid,
            in_specs=in_specs,
            out_specs=pl.BlockSpec((Bt, Tt, Cout_p), lambda b, t: (b, t, 0)),
            scratch_shapes=[
                pltpu.VMEM((Bt, pad_rows + Tt, Cin_p), cdtype),   # x history + current tile
                pltpu.VMEM((Bt, pad_rows + Tt, Cout_p), cdtype),  # h1 history + current tile
            ],
        ),
        compiler_params=pltpu.CompilerParams(
            dimension_semantics=("parallel", "arbitrary"),
            vmem_limit_bytes=vmem_limit),
        cost_estimate=cost,
    )(*args)

    return y_p[:, :, :Cout]


def temporal_block_forward(x_ncl, params, kernel_size, dilation, **kwargs):
    """Drop-in PyTorch layout: x (B, Cin, T) -> (B, Cout, T).  For stacked blocks prefer
    temporal_block_forward_tc (channels-last) and transpose only at the network edges."""
    y_tc = temporal_block_forward_tc(jnp.transpose(x_ncl, (0, 2, 1)), params,
                                     kernel_size, dilation, **kwargs)
    return jnp.transpose(y_tc, (0, 2, 1)).astype(x_ncl.dtype)


# -----------------------------------------------------------------------------
# Parameter setup (plain-JAX glue)
# -----------------------------------------------------------------------------
def init_temporal_block_params(key, n_inputs, n_outputs, kernel_size):
    ks = jax.random.split(key, 8)
    std = 0.01
    p = {
        "v1": std * jax.random.normal(ks[0], (n_outputs, n_inputs, kernel_size), jnp.float32),
        "g1": 1.0 + 0.1 * jax.random.normal(ks[1], (n_outputs,), jnp.float32),
        "b1": 0.1 * jax.random.normal(ks[2], (n_outputs,), jnp.float32),
        "v2": std * jax.random.normal(ks[3], (n_outputs, n_outputs, kernel_size), jnp.float32),
        "g2": 1.0 + 0.1 * jax.random.normal(ks[4], (n_outputs,), jnp.float32),
        "b2": 0.1 * jax.random.normal(ks[5], (n_outputs,), jnp.float32),
    }
    if n_inputs != n_outputs:
        p["wd"] = std * jax.random.normal(ks[6], (n_outputs, n_inputs, 1), jnp.float32)
        p["bd"] = 0.1 * jax.random.normal(ks[7], (n_outputs,), jnp.float32)
    return p


# -----------------------------------------------------------------------------
# Pure-JAX reference (correctness check only)
# -----------------------------------------------------------------------------
def _ref_conv1d(x_ncl, w_oik, b, dilation, padding):
    dn = lax.conv_dimension_numbers(x_ncl.shape, w_oik.shape, ("NCH", "OIH", "NCH"))
    y = lax.conv_general_dilated(x_ncl, w_oik, window_strides=(1,),
                                 padding=[(padding, padding)],
                                 rhs_dilation=(dilation,), dimension_numbers=dn)
    return y + b[None, :, None]


def temporal_block_reference(x_ncl, params, kernel_size, dilation):
    T = x_ncl.shape[2]
    pad = (kernel_size - 1) * dilation
    w1 = weight_norm_effective(params["v1"], params["g1"])
    w2 = weight_norm_effective(params["v2"], params["g2"])
    h = _ref_conv1d(x_ncl, w1, params["b1"], dilation, pad)[:, :, :T]   # chomp
    h = jnp.maximum(h, 0.0)
    h = _ref_conv1d(h, w2, params["b2"], dilation, pad)[:, :, :T]       # chomp
    h = jnp.maximum(h, 0.0)
    if "wd" in params:
        res = _ref_conv1d(x_ncl, params["wd"], params["bd"], 1, 0)
    else:
        res = x_ncl
    return jnp.maximum(h + res, 0.0)


# -----------------------------------------------------------------------------
if __name__ == "__main__":
    B, Cin, Cout, T = 2, 4, 8, 16
    kernel_size, dilation = 3, 2          # padding = (kernel_size - 1) * dilation = 4

    key = jax.random.PRNGKey(0)
    kx, kp, kp2, kx2 = jax.random.split(key, 4)
    x = jax.random.normal(kx, (B, Cin, T), jnp.float32)              # PyTorch NCL input
    params = init_temporal_block_params(kp, Cin, Cout, kernel_size)

    fwd = jax.jit(functools.partial(temporal_block_forward,
                                    kernel_size=kernel_size, dilation=dilation))
    y = jax.block_until_ready(fwd(x, params))
    y_ref = jax.block_until_ready(temporal_block_reference(x, params, kernel_size, dilation))
    assert y.shape == (B, Cout, T), y.shape
    assert jnp.max(jnp.abs(y - y_ref)) < 5e-4

    # Identity-residual branch (Cin == Cout, no downsample conv).
    params2 = init_temporal_block_params(kp2, Cout, Cout, kernel_size)
    x2 = jax.random.normal(kx2, (B, Cout, T), jnp.float32)
    y2 = jax.block_until_ready(fwd(x2, params2))
    y2_ref = temporal_block_reference(x2, params2, kernel_size, dilation)
    assert jnp.max(jnp.abs(y2 - y2_ref)) < 5e-4

    # Multi-tile time axis with causal carry across T tiles (and Bt > 1 batch tiles).
    T3 = 64
    x3 = jax.random.normal(kx, (B, Cin, T3), jnp.float32)
    y3 = jax.block_until_ready(temporal_block_forward(
        x3, params, kernel_size, dilation, time_tile=16, batch_tile=2))
    y3_ref = temporal_block_reference(x3, params, kernel_size, dilation)
    assert jnp.max(jnp.abs(y3 - y3_ref)) < 5e-4

    # bf16 storage / f32 accumulation path (looser, scale-aware tolerance).
    y4 = jax.block_until_ready(temporal_block_forward(
        x3, params, kernel_size, dilation, time_tile=32, compute_dtype=jnp.bfloat16))
    tol = 2e-2 * float(jnp.max(jnp.abs(y3_ref))) + 1e-3
    assert jnp.max(jnp.abs(y4 - y3_ref)) < tol

    print("KERNEL_OK")
</pallas_src>

<mosaic_0001>
module attributes {stable_mosaic.version = 11 : i64} {
  func.func @_temporal_block_kernel(%arg0: i32, %arg1: i32, %arg2: memref<1x16x128xf32, #tpu.memory_space<vmem>>, %arg3: memref<384x128xf32, #tpu.memory_space<vmem>>, %arg4: memref<1x128xf32, #tpu.memory_space<vmem>>, %arg5: memref<384x128xf32, #tpu.memory_space<vmem>>, %arg6: memref<1x128xf32, #tpu.memory_space<vmem>>, %arg7: memref<128x128xf32, #tpu.memory_space<vmem>>, %arg8: memref<1x128xf32, #tpu.memory_space<vmem>>, %arg9: memref<1x16x128xf32, #tpu.memory_space<vmem>>, %arg10: memref<1x24x128xf32, #tpu.memory_space<vmem>>, %arg11: memref<1x24x128xf32, #tpu.memory_space<vmem>>) attributes {dimension_semantics = [#tpu.dimension_semantics<parallel>, #tpu.dimension_semantics<arbitrary>], iteration_bounds = array<i64: 2, 1>, scalar_prefetch = 0 : i64, scratch_operands = 2 : i64, tpu.core_type = #tpu.core_type<tc>, window_params = [{transform_indices = @transform_0, window_bounds = array<i64: 1, 16, 128>}, {pipeline_mode = #tpu.pipeline_mode<synchronous>, transform_indices = @transform_1, window_bounds = array<i64: 384, 128>}, {pipeline_mode = #tpu.pipeline_mode<synchronous>, transform_indices = @transform_2, window_bounds = array<i64: 1, 128>}, {pipeline_mode = #tpu.pipeline_mode<synchronous>, transform_indices = @transform_3, window_bounds = array<i64: 384, 128>}, {pipeline_mode = #tpu.pipeline_mode<synchronous>, transform_indices = @transform_4, window_bounds = array<i64: 1, 128>}, {pipeline_mode = #tpu.pipeline_mode<synchronous>, transform_indices = @transform_5, window_bounds = array<i64: 128, 128>}, {pipeline_mode = #tpu.pipeline_mode<synchronous>, transform_indices = @transform_6, window_bounds = array<i64: 1, 128>}, {transform_indices = @transform_7, window_bounds = array<i64: 1, 16, 128>}]} {
    %c0_i32 = arith.constant 0 : i32
    %0 = arith.cmpi eq, %arg1, %c0_i32 : i32
    %1 = arith.extui %0 : i1 to i32
    %c0_i32_0 = arith.constant 0 : i32
    %2 = arith.cmpi ne, %1, %c0_i32_0 : i32
    scf.if %2 {
      %cst_56 = arith.constant 0.000000e+00 : f32
      %60 = vector.broadcast %cst_56 : f32 to vector<1x8x128xf32>
      %c0_57 = arith.constant 0 : index
      %c0_58 = arith.constant 0 : index
      %c0_59 = arith.constant 0 : index
      %61 = vector.load %arg10[%c0_57, %c0_58, %c0_59] : memref<1x24x128xf32, #tpu.memory_space<vmem>>, vector<1x8x128xf32>
      tpu.vector_store %arg10[%c0_57, %c0_58, %c0_59], %60 {strides = array<i32>} : memref<1x24x128xf32, #tpu.memory_space<vmem>>, vector<1x8x128xf32>,
      %cst_60 = arith.constant 0.000000e+00 : f32
      %62 = vector.broadcast %cst_60 : f32 to vector<1x8x128xf32>
      %c0_61 = arith.constant 0 : index
      %c0_62 = arith.constant 0 : index
      %c0_63 = arith.constant 0 : index
      %63 = vector.load %arg11[%c0_61, %c0_62, %c0_63] : memref<1x24x128xf32, #tpu.memory_space<vmem>>, vector<1x8x128xf32>
      tpu.vector_store %arg11[%c0_61, %c0_62, %c0_63], %62 {strides = array<i32>} : memref<1x24x128xf32, #tpu.memory_space<vmem>>, vector<1x8x128xf32>,
    } else {
    }
    %c0 = arith.constant 0 : index
    %c0_1 = arith.constant 0 : index
    %c0_2 = arith.constant 0 : index
    %3 = vector.load %arg2[%c0, %c0_1, %c0_2] : memref<1x16x128xf32, #tpu.memory_space<vmem>>, vector<1x16x128xf32>
    %c0_3 = arith.constant 0 : index
    %c8 = arith.constant 8 : index
    %c0_4 = arith.constant 0 : index
    %4 = vector.load %arg10[%c0_3, %c8, %c0_4] : memref<1x24x128xf32, #tpu.memory_space<vmem>>, vector<1x16x128xf32>
    tpu.vector_store %arg10[%c0_3, %c8, %c0_4], %3 {strides = array<i32>} : memref<1x24x128xf32, #tpu.memory_space<vmem>>, vector<1x16x128xf32>,
    %c0_5 = arith.constant 0 : index
    %c4 = arith.constant 4 : index
    %c0_6 = arith.constant 0 : index
    %5 = vector.load %arg10[%c0_5, %c4, %c0_6] : memref<1x24x128xf32, #tpu.memory_space<vmem>>, vector<1x16x128xf32>
    %6 = vector.shape_cast %5 : vector<1x16x128xf32> to vector<16x128xf32>
    %c0_7 = arith.constant 0 : index
    %c0_8 = arith.constant 0 : index
    %7 = vector.load %arg3[%c0_7, %c0_8] : memref<384x128xf32, #tpu.memory_space<vmem>>, vector<128x128xf32>
    %cst = arith.constant dense<0.000000e+00> : vector<16x128xf32>
    %8 = tpu.matmul %6, %7, %cst {dimension_numbers = #tpu.dot_dimension_numbers<[1], [0], [0], [1], [0, 0, 1, 1], [], []>} : vector<16x128xf32>, vector<128x128xf32>, vector<16x128xf32> -> vector<16x128xf32>
    %c0_9 = arith.constant 0 : index
    %c6 = arith.constant 6 : index
    %c0_10 = arith.constant 0 : index
    %9 = vector.load %arg10[%c0_9, %c6, %c0_10] : memref<1x24x128xf32, #tpu.memory_space<vmem>>, vector<1x16x128xf32>
    %10 = vector.shape_cast %9 : vector<1x16x128xf32> to vector<16x128xf32>
    %c128 = arith.constant 128 : index
    %c0_11 = arith.constant 0 : index
    %11 = vector.load %arg3[%c128, %c0_11] : memref<384x128xf32, #tpu.memory_space<vmem>>, vector<128x128xf32>
    %cst_12 = arith.constant dense<0.000000e+00> : vector<16x128xf32>
    %12 = tpu.matmul %10, %11, %cst_12 {dimension_numbers = #tpu.dot_dimension_numbers<[1], [0], [0], [1], [0, 0, 1, 1], [], []>} : vector<16x128xf32>, vector<128x128xf32>, vector<16x128xf32> -> vector<16x128xf32>
    %13 = arith.addf %8, %12 : vector<16x128xf32>
    %c0_13 = arith.constant 0 : index
    %c8_14 = arith.constant 8 : index
    %c0_15 = arith.constant 0 : index
    %14 = vector.load %arg10[%c0_13, %c8_14, %c0_15] : memref<1x24x128xf32, #tpu.memory_space<vmem>>, vector<1x16x128xf32>
    %15 = vector.shape_cast %14 : vector<1x16x128xf32> to vector<16x128xf32>
    %c256 = arith.constant 256 : index
    %c0_16 = arith.constant 0 : index
    %16 = vector.load %arg3[%c256, %c0_16] : memref<384x128xf32, #tpu.memory_space<vmem>>, vector<128x128xf32>
    %cst_17 = arith.constant dense<0.000000e+00> : vector<16x128xf32>
    %17 = tpu.matmul %15, %16, %cst_17 {dimension_numbers = #tpu.dot_dimension_numbers<[1], [0], [0], [1], [0, 0, 1, 1], [], []>} : vector<16x128xf32>, vector<128x128xf32>, vector<16x128xf32> -> vector<16x128xf32>
    %18 = arith.addf %13, %17 : vector<16x128xf32>
    %c0_18 = arith.constant 0 : index
    %c0_19 = arith.constant 0 : index
    %19 = vector.load %arg4[%c0_18, %c0_19] : memref<1x128xf32, #tpu.memory_space<vmem>>, vector<1x128xf32>
    %20 = vector.broadcast %19 : vector<1x128xf32> to vector<16x128xf32>
    %21 = arith.addf %18, %20 : vector<16x128xf32>
    %cst_20 = arith.constant 0.000000e+00 : f32
    %22 = vector.broadcast %cst_20 : f32 to vector<16x128xf32>
    %23 = arith.maximumf %21, %22 : vector<16x128xf32>
    %24 = vector.shape_cast %23 : vector<16x128xf32> to vector<1x16x128xf32>
    %c0_21 = arith.constant 0 : index
    %c8_22 = arith.constant 8 : index
    %c0_23 = arith.constant 0 : index
    %25 = vector.load %arg11[%c0_21, %c8_22, %c0_23] : memref<1x24x128xf32, #tpu.memory_space<vmem>>, vector<1x16x128xf32>
    tpu.vector_store %arg11[%c0_21, %c8_22, %c0_23], %24 {strides = array<i32>} : memref<1x24x128xf32, #tpu.memory_space<vmem>>, vector<1x16x128xf32>,
    %c0_24 = arith.constant 0 : index
    %c4_25 = arith.constant 4 : index
    %c0_26 = arith.constant 0 : index
    %26 = vector.load %arg11[%c0_24, %c4_25, %c0_26] : memref<1x24x128xf32, #tpu.memory_space<vmem>>, vector<1x16x128xf32>
    %27 = vector.shape_cast %26 : vector<1x16x128xf32> to vector<16x128xf32>
    %c0_27 = arith.constant 0 : index
    %c0_28 = arith.constant 0 : index
    %28 = vector.load %arg5[%c0_27, %c0_28] : memref<384x128xf32, #tpu.memory_space<vmem>>, vector<128x128xf32>
    %cst_29 = arith.constant dense<0.000000e+00> : vector<16x128xf32>
    %29 = tpu.matmul %27, %28, %cst_29 {dimension_numbers = #tpu.dot_dimension_numbers<[1], [0], [0], [1], [0, 0, 1, 1], [], []>} : vector<16x128xf32>, vector<128x128xf32>, vector<16x128xf32> -> vector<16x128xf32>
    %c0_30 = arith.constant 0 : index
    %c6_31 = arith.constant 6 : index
    %c0_32 = arith.constant 0 : index
    %30 = vector.load %arg11[%c0_30, %c6_31, %c0_32] : memref<1x24x128xf32, #tpu.memory_space<vmem>>, vector<1x16x128xf32>
    %31 = vector.shape_cast %30 : vector<1x16x128xf32> to vector<16x128xf32>
    %c128_33 = arith.constant 128 : index
    %c0_34 = arith.constant 0 : index
    %32 = vector.load %arg5[%c128_33, %c0_34] : memref<384x128xf32, #tpu.memory_space<vmem>>, vector<128x128xf32>
    %cst_35 = arith.constant dense<0.000000e+00> : vector<16x128xf32>
    %33 = tpu.matmul %31, %32, %cst_35 {dimension_numbers = #tpu.dot_dimension_numbers<[1], [0], [0], [1], [0, 0, 1, 1], [], []>} : vector<16x128xf32>, vector<128x128xf32>, vector<16x128xf32> -> vector<16x128xf32>
    %34 = arith.addf %29, %33 : vector<16x128xf32>
    %c0_36 = arith.constant 0 : index
    %c8_37 = arith.constant 8 : index
    %c0_38 = arith.constant 0 : index
    %35 = vector.load %arg11[%c0_36, %c8_37, %c0_38] : memref<1x24x128xf32, #tpu.memory_space<vmem>>, vector<1x16x128xf32>
    %36 = vector.shape_cast %35 : vector<1x16x128xf32> to vector<16x128xf32>
    %c256_39 = arith.constant 256 : index
    %c0_40 = arith.constant 0 : index
    %37 = vector.load %arg5[%c256_39, %c0_40] : memref<384x128xf32, #tpu.memory_space<vmem>>, vector<128x128xf32>
    %cst_41 = arith.constant dense<0.000000e+00> : vector<16x128xf32>
    %38 = tpu.matmul %36, %37, %cst_41 {dimension_numbers = #tpu.dot_dimension_numbers<[1], [0], [0], [1], [0, 0, 1, 1], [], []>} : vector<16x128xf32>, vector<128x128xf32>, vector<16x128xf32> -> vector<16x128xf32>
    %39 = arith.addf %34, %38 : vector<16x128xf32>
    %c0_42 = arith.constant 0 : index
    %c0_43 = arith.constant 0 : index
    %40 = vector.load %arg6[%c0_42, %c0_43] : memref<1x128xf32, #tpu.memory_space<vmem>>, vector<1x128xf32>
    %41 = vector.broadcast %40 : vector<1x128xf32> to vector<16x128xf32>
    %42 = arith.addf %39, %41 : vector<16x128xf32>
    %cst_44 = arith.constant 0.000000e+00 : f32
    %43 = vector.broadcast %cst_44 : f32 to vector<16x128xf32>
    %44 = arith.maximumf %42, %43 : vector<16x128xf32>
    %45 = vector.shape_cast %3 : vector<1x16x128xf32> to vector<16x128xf32>
    %c0_45 = arith.constant 0 : index
    %c0_46 = arith.constant 0 : index
    %46 = vector.load %arg7[%c0_45, %c0_46] : memref<128x128xf32, #tpu.memory_space<vmem>>, vector<128x128xf32>
    %cst_47 = arith.constant dense<0.000000e+00> : vector<16x128xf32>
    %47 = tpu.matmul %45, %46, %cst_47 {dimension_numbers = #tpu.dot_dimension_numbers<[1], [0], [0], [1], [0, 0, 1, 1], [], []>} : vector<16x128xf32>, vector<128x128xf32>, vector<16x128xf32> -> vector<16x128xf32>
    %c0_48 = arith.constant 0 : index
    %c0_49 = arith.constant 0 : index
    %48 = vector.load %arg8[%c0_48, %c0_49] : memref<1x128xf32, #tpu.memory_space<vmem>>, vector<1x128xf32>
    %49 = vector.broadcast %48 : vector<1x128xf32> to vector<16x128xf32>
    %50 = arith.addf %47, %49 : vector<16x128xf32>
    %51 = arith.addf %44, %50 : vector<16x128xf32>
    %cst_50 = arith.constant 0.000000e+00 : f32
    %52 = vector.broadcast %cst_50 : f32 to vector<16x128xf32>
    %53 = arith.maximumf %51, %52 : vector<16x128xf32>
    %54 = vector.shape_cast %53 : vector<16x128xf32> to vector<1x16x128xf32>
    %c0_51 = arith.constant 0 : index
    %c0_52 = arith.constant 0 : index
    %c0_53 = arith.constant 0 : index
    %55 = vector.load %arg9[%c0_51, %c0_52, %c0_53] : memref<1x16x128xf32, #tpu.memory_space<vmem>>, vector<1x16x128xf32>
    tpu.vector_store %arg9[%c0_51, %c0_52, %c0_53], %54 {strides = array<i32>} : memref<1x16x128xf32, #tpu.memory_space<vmem>>, vector<1x16x128xf32>,
    %c1_i32 = arith.constant 1 : i32
    %56 = arith.addi %arg1, %c1_i32 : i32
    %c1_i32_54 = arith.constant 1 : i32
    %57 = arith.cmpi slt, %56, %c1_i32_54 : i32
    %58 = arith.extui %57 : i1 to i32
    %c0_i32_55 = arith.constant 0 : i32
    %59 = arith.cmpi ne, %58, %c0_i32_55 : i32
    scf.if %59 {
      %c0_56 = arith.constant 0 : index
      %c16 = arith.constant 16 : index
      %c0_57 = arith.constant 0 : index
      %60 = vector.load %arg10[%c0_56, %c16, %c0_57] : memref<1x24x128xf32, #tpu.memory_space<vmem>>, vector<1x8x128xf32>
      %c0_58 = arith.constant 0 : index
      %c0_59 = arith.constant 0 : index
      %c0_60 = arith.constant 0 : index
      %61 = vector.load %arg10[%c0_58, %c0_59, %c0_60] : memref<1x24x128xf32, #tpu.memory_space<vmem>>, vector<1x8x128xf32>
      tpu.vector_store %arg10[%c0_58, %c0_59, %c0_60], %60 {strides = array<i32>} : memref<1x24x128xf32, #tpu.memory_space<vmem>>, vector<1x8x128xf32>,
      %c0_61 = arith.constant 0 : index
      %c16_62 = arith.constant 16 : index
      %c0_63 = arith.constant 0 : index
      %62 = vector.load %arg11[%c0_61, %c16_62, %c0_63] : memref<1x24x128xf32, #tpu.memory_space<vmem>>, vector<1x8x128xf32>
      %c0_64 = arith.constant 0 : index
      %c0_65 = arith.constant 0 : index
      %c0_66 = arith.constant 0 : index
      %63 = vector.load %arg11[%c0_64, %c0_65, %c0_66] : memref<1x24x128xf32, #tpu.memory_space<vmem>>, vector<1x8x128xf32>
      tpu.vector_store %arg11[%c0_64, %c0_65, %c0_66], %62 {strides = array<i32>} : memref<1x24x128xf32, #tpu.memory_space<vmem>>, vector<1x8x128xf32>,
    } else {
    }
    return
  }
  func.func @transform_0(%arg0: i32, %arg1: i32) -> (i32, i32, i32) {
    %c0_i32 = arith.constant 0 : i32
    %c0_i32_0 = arith.constant 0 : i32
    return %arg0, %arg1, %c0_i32 : i32, i32, i32
  }
  func.func @transform_1(%arg0: i32, %arg1: i32) -> (i32, i32) {
    %c0_i32 = arith.constant 0 : i32
    %c0_i32_0 = arith.constant 0 : i32
    %c0_i32_1 = arith.constant 0 : i32
    return %c0_i32, %c0_i32_0 : i32, i32
  }
  func.func @transform_2(%arg0: i32, %arg1: i32) -> (i32, i32) {
    %c0_i32 = arith.constant 0 : i32
    %c0_i32_0 = arith.constant 0 : i32
    %c0_i32_1 = arith.constant 0 : i32
    return %c0_i32, %c0_i32_0 : i32, i32
  }
  func.func @transform_3(%arg0: i32, %arg1: i32) -> (i32, i32) {
    %c0_i32 = arith.constant 0 : i32
    %c0_i32_0 = arith.constant 0 : i32
    %c0_i32_1 = arith.constant 0 : i32
    return %c0_i32, %c0_i32_0 : i32, i32
  }
  func.func @transform_4(%arg0: i32, %arg1: i32) -> (i32, i32) {
    %c0_i32 = arith.constant 0 : i32
    %c0_i32_0 = arith.constant 0 : i32
    %c0_i32_1 = arith.constant 0 : i32
    return %c0_i32, %c0_i32_0 : i32, i32
  }
  func.func @transform_5(%arg0: i32, %arg1: i32) -> (i32, i32) {
    %c0_i32 = arith.constant 0 : i32
    %c0_i32_0 = arith.constant 0 : i32
    %c0_i32_1 = arith.constant 0 : i32
    return %c0_i32, %c0_i32_0 : i32, i32
  }
  func.func @transform_6(%arg0: i32, %arg1: i32) -> (i32, i32) {
    %c0_i32 = arith.constant 0 : i32
    %c0_i32_0 = arith.constant 0 : i32
    %c0_i32_1 = arith.constant 0 : i32
    return %c0_i32, %c0_i32_0 : i32, i32
  }
  func.func @transform_7(%arg0: i32, %arg1: i32) -> (i32, i32, i32) {
    %c0_i32 = arith.constant 0 : i32
    %c0_i32_0 = arith.constant 0 : i32
    return %arg0, %arg1, %c0_i32 : i32, i32, i32
  }
}

</mosaic_0001>

<bundles_post_ra>
// kernel: temporal_block_forward.1
= control target key start
LH: loop header
LB: loop body
LE: loop exit
PB: predicated region body
PF: predicated region fallthrough
CT: control target
= control target key end

     0   :  { %s1591_s24 = smov 0   ;;  %s1593_s25 = smov 0   ;;  %s1993_s0 = inlined_call_operand.vmem [shape: f32[2,16,128], index: 0, kind: input, shape index: {}]   ;;  %s1994_s1 = inlined_call_operand.vmem [shape: f32[384,128], index: 1, kind: input, shape index: {}]   ;;  %s1995_s2 = inlined_call_operand.vmem [shape: f32[1,128], index: 2, kind: input, shape index: {}]   ;;  %s1996_s3 = inlined_call_operand.vmem [shape: f32[384,128], index: 3, kind: input, shape index: {}]   ;;  %s1997_s4 = inlined_call_operand.vmem [shape: f32[1,128], index: 4, kind: input, shape index: {}]   ;;  %s1998_s5 = inlined_call_operand.vmem [shape: f32[128,128], index: 5, kind: input, shape index: {}]   ;;  %s1999_s6 = inlined_call_operand.vmem [shape: f32[1,128], index: 6, kind: input, shape index: {}]   ;;  %s2000_s7 = inlined_call_operand.vmem [shape: f32[2,16,128], index: 7, kind: output, shape index: {}]  }
   0x1   :  { %s1595_s26 = smov 0  }
   0x2 LB: > { %s29_s27 = sadd.s32 1, %s1544_s25  ;;  %p1118_p0 = scmp.ge.s32.totalorder %s1548_s26, 1  ;;  %s1548_s26 = sphi %s1595_s26, %s17_s26   ;;  %s1544_s25 = sphi %s1593_s25, %s2002_s25   ;;  %s1540_s24 = sphi %s1591_s24, %s2001_s24  }
   0x3   : > { %p31_p1 = scmp.ge.s32.totalorder %s29_s27, 2  ;;  %p258_p2 = scmp.lt.s32.totalorder %s1548_s26, 3 }
   0x5   : > { %s2004_s27 = smov (%p31_p1, %s29_s27), 0  ;;  %p259_p3 = pnand %p1118_p0, %p258_p2 }
   0x6   : > { %p299_p4 = scmp.lt.s32.totalorder (!%p259_p3), %s1540_s24, 1 }
   0x7   : > { %262 = sbr.rel (%p259_p3) target bundleno = 527 (0x20f), region = 48 }
   0xc   : > { %v363_v0 = vld [vmem:[%s1994_s1 + $0xf8] sm:$0xff]  ;;  %v362_v2 = vld [vmem:[%s1994_s1 + $0xf0] sm:$0xff]  ;;  %v1550_v4 = vmov 0.0   ;;  %v361_v5 = vld [vmem:[%s1994_s1 + $0xe8] sm:$0xff]  ;;  %s2006_s24 = smov (!%p299_p4, %s1540_s24), 1 }
   0xd   : > { %v345_v1 = vld [vmem:[%s1994_s1 + $0x78] sm:$0xff]  ;;  %1256 = vmatprep.subr.mxu0 %v363_v0  ;;  %v344_v3 = vld [vmem:[%s1994_s1 + $0x70] sm:$0xff]  ;;  %322 = vst [vmem:[#allocation2] sm:$0xff] %v1550_v4  ;;  %323 = vst [vmem:[#allocation3] sm:$0xff] %v1550_v4  ;;  %s1128_s21 = sshll.u32 %s2006_s24, 4 }
   0xe   : > { %1291 = vmatprep.subr.mxu1 %v345_v1  ;;  %1257 = vmatpush3.msra.mxu0 %v363_v0  ;;  %v343_v6 = vld [vmem:[%s1994_s1 + $0x68] sm:$0xff]  ;;  %v360_v7 = vld [vmem:[%s1994_s1 + $0xe0] sm:$0xff]  ;;  %v359_v9 = vld [vmem:[%s1994_s1 + $0xd8] sm:$0xff]  ;;  %s306_s9 = scalar_lea.vmem %s1993_s0, %s1128_s21  ;;  %s316_s29 = scalar_lea.vmem %s2000_s7, %s1128_s21 }
   0xf   : > { %1292 = vmatpush3.msra.mxu1 %v345_v1  ;;  %1258 = vmatprep.subr.mxu0 %v362_v2  ;;  %v342_v8 = vld [vmem:[%s1994_s1 + $0x60] sm:$0xff]  ;;  %v341_v10 = vld [vmem:[%s1994_s1 + $0x58] sm:$0xff]  ;;  %v358_v11 = vld [vmem:[%s1994_s1 + $0xd0] sm:$0xff] }
  0x10   : > { %1293 = vmatprep.subr.mxu1 %v344_v3  ;;  %1259 = vmatpush3.msra.mxu0 %v362_v2  ;;  %v340_v12 = vld [vmem:[%s1994_s1 + $0x50] sm:$0xff]  ;;  %v357_v13 = vld [vmem:[%s1994_s1 + $0xc8] sm:$0xff]  ;;  %v1659_v15 = vld [vmem:[%s306_s9] sm:$0xff] }
  0x11   : > { %1294 = vmatpush3.msra.mxu1 %v344_v3  ;;  %1260 = vmatprep.subr.mxu0 %v361_v5  ;;  %v339_v14 = vld [vmem:[%s1994_s1 + $0x48] sm:$0xff]  ;;  %326 = vst [vmem:[#allocation2 + $0x8] sm:$0xff] %v1659_v15  ;;  %v356_v17 = vld [vmem:[%s1994_s1 + $0xc0] sm:$0xff]  ;;  %v355_v19 = vld [vmem:[%s1994_s1 + $0xb8] sm:$0xff] }
  0x12   : > { %1295 = vmatprep.subr.mxu1 %v343_v6  ;;  %1261 = vmatpush3.msra.mxu0 %v361_v5  ;;  %v1662_v16 = vld [vmem:[%s306_s9 + $0x8] sm:$0xff]  ;;  %v338_v18 = vld [vmem:[%s1994_s1 + $0x40] sm:$0xff]  ;;  %v337_v20 = vld [vmem:[%s1994_s1 + $0x38] sm:$0xff] }
  0x13   : > { %1296 = vmatpush3.msra.mxu1 %v343_v6  ;;  %1262 = vmatprep.subr.mxu0 %v360_v7  ;;  %327 = vst [vmem:[#allocation2 + $0x10] sm:$0xff] %v1662_v16  ;;  %v354_v21 = vld [vmem:[%s1994_s1 + $0xb0] sm:$0xff]  ;;  %v353_v23 = vld [vmem:[%s1994_s1 + $0xa8] sm:$0xff]  ;;  %v352_v25 = vld [vmem:[%s1994_s1 + $0xa0] sm:$0xff] }
  0x14   : > { %1297 = vmatprep.subr.mxu1 %v342_v8  ;;  %1263 = vmatpush3.msra.mxu0 %v360_v7  ;;  %v336_v22 = vld [vmem:[%s1994_s1 + $0x30] sm:$0xff]  ;;  %v335_v24 = vld [vmem:[%s1994_s1 + $0x28] sm:$0xff]  ;;  %v334_v26 = vld [vmem:[%s1994_s1 + $0x20] sm:$0xff] }
  0x15   : > { %1298 = vmatpush3.msra.mxu1 %v342_v8  ;;  %1264 = vmatprep.subr.mxu0 %v359_v9  ;;  %v351_v27 = vld [vmem:[%s1994_s1 + $0x98] sm:$0xff]  ;;  %v350_v29 = vld [vmem:[%s1994_s1 + $0x90] sm:$0xff]  ;;  %v349_v31 = vld [vmem:[%s1994_s1 + $0x88] sm:$0xff] }
  0x16   : > { %1299 = vmatprep.subr.mxu1 %v341_v10  ;;  %1265 = vmatpush3.msra.mxu0 %v359_v9  ;;  %v333_v28 = vld [vmem:[%s1994_s1 + $0x18] sm:$0xff]  ;;  %v332_v30 = vld [vmem:[%s1994_s1 + $0x10] sm:$0xff]  ;;  %v331_v32 = vld [vmem:[%s1994_s1 + $0x8] sm:$0xff] }
  0x17   : > { %1300 = vmatpush3.msra.mxu1 %v341_v10  ;;  %1266 = vmatprep.subr.mxu0 %v358_v11  ;;  %v348_v33 = vld [vmem:[%s1994_s1 + $0x80] sm:$0xff]  ;;  %v531_v39 = vld [vmem:[%s1994_s1 + $0x178] sm:$0xff]  ;;  %v530_v40 = vld [vmem:[%s1994_s1 + $0x170] sm:$0xff] }
  0x18   : > { %1301 = vmatprep.subr.mxu1 %v340_v12  ;;  %1267 = vmatpush3.msra.mxu0 %v358_v11  ;;  %v330_v34 = vld [vmem:[%s1994_s1] sm:$0xff]  ;;  %v529_v41 = vld [vmem:[%s1994_s1 + $0x168] sm:$0xff]  ;;  %v527_v43 = vld [vmem:[%s1994_s1 + $0x158] sm:$0xff] }
  0x19   : > { %1302 = vmatpush3.msra.mxu1 %v340_v12  ;;  %1268 = vmatprep.subr.mxu0 %v357_v13  ;;  %v346_v35 = vld [vmem:[#allocation2 + $0x6] sm:$0xff]  ;;  %v526_v44 = vld [vmem:[%s1994_s1 + $0x150] sm:$0xff]  ;;  %v523_v47 = vld [vmem:[%s1994_s1 + $0x138] sm:$0xff] }
  0x1a   : > { %1303 = vmatprep.subr.mxu1 %v339_v14  ;;  %1269 = vmatpush3.msra.mxu0 %v357_v13  ;;  %v328_v36 = vld [vmem:[#allocation2 + $0x4] sm:$0xff]  ;;  %v347_v37 = vld [vmem:[#allocation2 + $0xe] sm:$0xff]  ;;  %v519_v51 = vld [vmem:[%s1994_s1 + $0x118] sm:$0xff] }
  0x1b   : > { %1304 = vmatpush3.msra.mxu1 %v339_v14  ;;  %1270 = vmatprep.subr.mxu0 %v356_v17  ;;  %v329_v38 = vld [vmem:[#allocation2 + $0xc] sm:$0xff]  ;;  %v528_v42 = vld [vmem:[%s1994_s1 + $0x160] sm:$0xff]  ;;  %v657_v55 = vld [vmem:[%s1996_s3 + $0xf8] sm:$0xff] }
  0x1c   : > { %1305 = vmatprep.subr.mxu1 %v338_v18  ;;  %1271 = vmatpush3.msra.mxu0 %v356_v17  ;;  %v525_v45 = vld [vmem:[%s1994_s1 + $0x148] sm:$0xff]  ;;  %v524_v46 = vld [vmem:[%s1994_s1 + $0x140] sm:$0xff]  ;;  %v522_v48 = vld [vmem:[%s1994_s1 + $0x130] sm:$0xff] }
  0x1d   : > { %1306 = vmatpush3.msra.mxu1 %v338_v18  ;;  %1272 = vmatprep.subr.mxu0 %v355_v19  ;;  %v521_v49 = vld [vmem:[%s1994_s1 + $0x128] sm:$0xff]  ;;  %v520_v50 = vld [vmem:[%s1994_s1 + $0x120] sm:$0xff]  ;;  %v518_v52 = vld [vmem:[%s1994_s1 + $0x110] sm:$0xff] }
  0x1e   : > { %1307 = vmatprep.subr.mxu1 %v337_v20  ;;  %1273 = vmatpush3.msra.mxu0 %v355_v19  ;;  %v517_v53 = vld [vmem:[%s1994_s1 + $0x108] sm:$0xff]  ;;  %v516_v54 = vld [vmem:[%s1994_s1 + $0x100] sm:$0xff]  ;;  %v639_v56 = vld [vmem:[%s1996_s3 + $0x78] sm:$0xff] }
  0x1f   : > { %1308 = vmatpush3.msra.mxu1 %v337_v20  ;;  %1274 = vmatprep.subr.mxu0 %v354_v21  ;;  %v656_v57 = vld [vmem:[%s1996_s3 + $0xf0] sm:$0xff]  ;;  %v655_v59 = vld [vmem:[%s1996_s3 + $0xe8] sm:$0xff]  ;;  %v654_v61 = vld [vmem:[%s1996_s3 + $0xe0] sm:$0xff] }
  0x20   : > { %1309 = vmatprep.subr.mxu1 %v336_v22  ;;  %1275 = vmatpush3.msra.mxu0 %v354_v21  ;;  %v638_v58 = vld [vmem:[%s1996_s3 + $0x70] sm:$0xff]  ;;  %v637_v60 = vld [vmem:[%s1996_s3 + $0x68] sm:$0xff]  ;;  %v636_v62 = vld [vmem:[%s1996_s3 + $0x60] sm:$0xff] }
  0x21   : > { %1310 = vmatpush3.msra.mxu1 %v336_v22  ;;  %1276 = vmatprep.subr.mxu0 %v353_v23  ;;  %v653_v63 = vld [vmem:[%s1996_s3 + $0xd8] sm:$0xff]  ;;  %v652_v1 = vld [vmem:[%s1996_s3 + $0xd0] sm:$0xff]  ;;  %v651_v3 = vld [vmem:[%s1996_s3 + $0xc8] sm:$0xff] }
  0x22   : > { %1311 = vmatprep.subr.mxu1 %v335_v24  ;;  %1277 = vmatpush3.msra.mxu0 %v353_v23  ;;  %v635_v0 = vld [vmem:[%s1996_s3 + $0x58] sm:$0xff]  ;;  %v634_v2 = vld [vmem:[%s1996_s3 + $0x50] sm:$0xff]  ;;  %v633_v4 = vld [vmem:[%s1996_s3 + $0x48] sm:$0xff] }
  0x23   : > { %1312 = vmatpush3.msra.mxu1 %v335_v24  ;;  %1278 = vmatprep.subr.mxu0 %v352_v25  ;;  %v650_v5 = vld [vmem:[%s1996_s3 + $0xc0] sm:$0xff]  ;;  %v649_v7 = vld [vmem:[%s1996_s3 + $0xb8] sm:$0xff]  ;;  %v648_v9 = vld [vmem:[%s1996_s3 + $0xb0] sm:$0xff] }
  0x24   : > { %1313 = vmatprep.subr.mxu1 %v334_v26  ;;  %1279 = vmatpush3.msra.mxu0 %v352_v25  ;;  %v632_v6 = vld [vmem:[%s1996_s3 + $0x40] sm:$0xff]  ;;  %v631_v8 = vld [vmem:[%s1996_s3 + $0x38] sm:$0xff]  ;;  %v630_v10 = vld [vmem:[%s1996_s3 + $0x30] sm:$0xff] }
  0x25   : > { %1314 = vmatpush3.msra.mxu1 %v334_v26  ;;  %1280 = vmatprep.subr.mxu0 %v351_v27  ;;  %v647_v11 = vld [vmem:[%s1996_s3 + $0xa8] sm:$0xff]  ;;  %v646_v13 = vld [vmem:[%s1996_s3 + $0xa0] sm:$0xff]  ;;  %v645_v17 = vld [vmem:[%s1996_s3 + $0x98] sm:$0xff] }
  0x26   : > { %1315 = vmatprep.subr.mxu1 %v333_v28  ;;  %1281 = vmatpush3.msra.mxu0 %v351_v27  ;;  %v629_v12 = vld [vmem:[%s1996_s3 + $0x28] sm:$0xff]  ;;  %v628_v14 = vld [vmem:[%s1996_s3 + $0x20] sm:$0xff]  ;;  %v627_v18 = vld [vmem:[%s1996_s3 + $0x18] sm:$0xff] }
  0x27   : > { %1316 = vmatpush3.msra.mxu1 %v333_v28  ;;  %1282 = vmatprep.subr.mxu0 %v350_v29  ;;  %v644_v19 = vld [vmem:[%s1996_s3 + $0x90] sm:$0xff]  ;;  %v643_v21 = vld [vmem:[%s1996_s3 + $0x88] sm:$0xff]  ;;  %v642_v23 = vld [vmem:[%s1996_s3 + $0x80] sm:$0xff] }
  0x28   : > { %1317 = vmatprep.subr.mxu1 %v332_v30  ;;  %1283 = vmatpush3.msra.mxu0 %v350_v29  ;;  %v626_v20 = vld [vmem:[%s1996_s3 + $0x10] sm:$0xff]  ;;  %v625_v22 = vld [vmem:[%s1996_s3 + $0x8] sm:$0xff]  ;;  %v624_v24 = vld [vmem:[%s1996_s3] sm:$0xff] }
  0x29   : > { %1318 = vmatpush3.msra.mxu1 %v332_v30  ;;  %1284 = vmatprep.subr.mxu0 %v349_v31  ;;  %v825_v25 = vld [vmem:[%s1996_s3 + $0x178] sm:$0xff] }
  0x2a   : > { %1319 = vmatprep.subr.mxu1 %v331_v32  ;;  %1285 = vmatpush3.msra.mxu0 %v349_v31  ;;  %v929_v26 = vld [vmem:[%s1998_s5 + $0x78] sm:$0xff] }
  0x2b   : > { %1320 = vmatpush3.msra.mxu1 %v331_v32  ;;  %1286 = vmatprep.subr.mxu0 %v348_v33 }
  0x2c   : > { %1321 = vmatprep.subr.mxu1 %v330_v34  ;;  %1287 = vmatpush3.msra.mxu0 %v348_v33  ;;  %v1123_v33 = vld [vmem:[%s1995_s2] ss:$0 sm:$0xff] }
  0x2d   : > { %1288 = vmatprep.mubr.f32.mxu0 %v346_v35  ;;  %1322 = vmatpush3.msra.mxu1 %v330_v34 }
  0x2e   : > { %1323 = vmatprep.mubr.f32.mxu1 %v328_v36  ;;  %1289 = vmatmul.mubr.f32.vlgmr.msra.gmra.mxu0 %v347_v37 }
  0x2f   : > { %1324 = vmatmul.mubr.f32.vlgmr.msra.gmra.mxu1 %v329_v38  ;;  %1326 = vmatprep.subr.mxu0 %v531_v39 }
  0x30   : > { %1358 = vmatprep.mubr.f32.mxu0 %v1659_v15  ;;  %1327 = vmatpush3.msra.mxu0 %v531_v39 }
  0x31   : > { %1328 = vmatprep.subr.mxu0 %v530_v40  ;;  %1361 = vmatprep.subr.mxu1 %v657_v55 }
  0x32   : > { %1329 = vmatpush3.msra.mxu0 %v530_v40  ;;  %1362 = vmatpush3.msra.mxu1 %v657_v55  ;;  %v924_v55 = vld [vmem:[%s1998_s5 + $0x50] sm:$0xff] }
  0x33   : > { %1330 = vmatprep.subr.mxu0 %v529_v41  ;;  %1363 = vmatprep.subr.mxu1 %v656_v57 }
  0x34   : > { %1331 = vmatpush3.msra.mxu0 %v529_v41  ;;  %1364 = vmatpush3.msra.mxu1 %v656_v57  ;;  %v923_v57 = vld [vmem:[%s1998_s5 + $0x48] sm:$0xff] }
  0x35   : > { %1332 = vmatprep.subr.mxu0 %v528_v42  ;;  %1365 = vmatprep.subr.mxu1 %v655_v59 }
  0x36   : > { %1333 = vmatpush3.msra.mxu0 %v528_v42  ;;  %1366 = vmatpush3.msra.mxu1 %v655_v59  ;;  %v922_v59 = vld [vmem:[%s1998_s5 + $0x40] sm:$0xff] }
  0x37   : > { %1334 = vmatprep.subr.mxu0 %v527_v43  ;;  %1367 = vmatprep.subr.mxu1 %v654_v61 }
  0x38   : > { %1335 = vmatpush3.msra.mxu0 %v527_v43  ;;  %1368 = vmatpush3.msra.mxu1 %v654_v61  ;;  %v921_v61 = vld [vmem:[%s1998_s5 + $0x38] sm:$0xff] }
  0x39   : > { %1336 = vmatprep.subr.mxu0 %v526_v44  ;;  %1369 = vmatprep.subr.mxu1 %v653_v63 }
  0x3a   : > { %1337 = vmatpush3.msra.mxu0 %v526_v44  ;;  %1370 = vmatpush3.msra.mxu1 %v653_v63  ;;  %v920_v63 = vld [vmem:[%s1998_s5 + $0x30] sm:$0xff] }
  0x3b   : > { %1338 = vmatprep.subr.mxu0 %v525_v45  ;;  %1371 = vmatprep.subr.mxu1 %v652_v1 }
  0x3c   : > { %1339 = vmatpush3.msra.mxu0 %v525_v45  ;;  %1372 = vmatpush3.msra.mxu1 %v652_v1  ;;  %v919_v1 = vld [vmem:[%s1998_s5 + $0x28] sm:$0xff] }
  0x3d   : > { %1340 = vmatprep.subr.mxu0 %v524_v46  ;;  %1373 = vmatprep.subr.mxu1 %v651_v3 }
  0x3e   : > { %1341 = vmatpush3.msra.mxu0 %v524_v46  ;;  %1374 = vmatpush3.msra.mxu1 %v651_v3  ;;  %v824_v46 = vld [vmem:[%s1996_s3 + $0x170] sm:$0xff]  ;;  %v918_v3 = vld [vmem:[%s1998_s5 + $0x20] sm:$0xff] }
  0x3f   : > { %1342 = vmatprep.subr.mxu0 %v523_v47  ;;  %1375 = vmatprep.subr.mxu1 %v650_v5 }
  0x40   : > { %1343 = vmatpush3.msra.mxu0 %v523_v47  ;;  %1376 = vmatpush3.msra.mxu1 %v650_v5  ;;  %v928_v47 = vld [vmem:[%s1998_s5 + $0x70] sm:$0xff]  ;;  %v917_v5 = vld [vmem:[%s1998_s5 + $0x18] sm:$0xff] }
  0x41   : > { %1344 = vmatprep.subr.mxu0 %v522_v48  ;;  %1377 = vmatprep.subr.mxu1 %v649_v7 }
  0x42   : > { %1345 = vmatpush3.msra.mxu0 %v522_v48  ;;  %1378 = vmatpush3.msra.mxu1 %v649_v7  ;;  %v823_v48 = vld [vmem:[%s1996_s3 + $0x168] sm:$0xff]  ;;  %v916_v7 = vld [vmem:[%s1998_s5 + $0x10] sm:$0xff] }
  0x43   : > { %1346 = vmatprep.subr.mxu0 %v521_v49  ;;  %1379 = vmatprep.subr.mxu1 %v648_v9 }
  0x44   : > { %1347 = vmatpush3.msra.mxu0 %v521_v49  ;;  %1380 = vmatpush3.msra.mxu1 %v648_v9  ;;  %v927_v49 = vld [vmem:[%s1998_s5 + $0x68] sm:$0xff] }
  0x45   : > { %1348 = vmatprep.subr.mxu0 %v520_v50  ;;  %1381 = vmatprep.subr.mxu1 %v647_v11  ;;  %v915_v9 = vld [vmem:[%s1998_s5 + $0x8] sm:$0xff] }
  0x46   : > { %1349 = vmatpush3.msra.mxu0 %v520_v50  ;;  %1382 = vmatpush3.msra.mxu1 %v647_v11  ;;  %v822_v50 = vld [vmem:[%s1996_s3 + $0x160] sm:$0xff] }
  0x47   : > { %1350 = vmatprep.subr.mxu0 %v519_v51  ;;  %1383 = vmatprep.subr.mxu1 %v646_v13  ;;  %v914_v11 = vld [vmem:[%s1998_s5] sm:$0xff] }
  0x48   : > { %1351 = vmatpush3.msra.mxu0 %v519_v51  ;;  %1384 = vmatpush3.msra.mxu1 %v646_v13  ;;  %v926_v51 = vld [vmem:[%s1998_s5 + $0x60] sm:$0xff] }
  0x49   : > { %1352 = vmatprep.subr.mxu0 %v518_v52  ;;  %1385 = vmatprep.subr.mxu1 %v645_v17 }
  0x4a   : > { %1353 = vmatpush3.msra.mxu0 %v518_v52  ;;  %1386 = vmatpush3.msra.mxu1 %v645_v17  ;;  %v821_v52 = vld [vmem:[%s1996_s3 + $0x158] sm:$0xff] }
  0x4b   : > { %1354 = vmatprep.subr.mxu0 %v517_v53  ;;  %1387 = vmatprep.subr.mxu1 %v644_v19 }
  0x4c   : > { %1355 = vmatpush3.msra.mxu0 %v517_v53  ;;  %1388 = vmatpush3.msra.mxu1 %v644_v19  ;;  %v925_v53 = vld [vmem:[%s1998_s5 + $0x58] sm:$0xff] }
  0x4d   : > { %1356 = vmatprep.subr.mxu0 %v516_v54  ;;  %1389 = vmatprep.subr.mxu1 %v643_v21 }
  0x4e   : > { %1357 = vmatpush3.msra.mxu0 %v516_v54  ;;  %1390 = vmatpush3.msra.mxu1 %v643_v21  ;;  %v820_v54 = vld [vmem:[%s1996_s3 + $0x150] sm:$0xff]  ;;  %v1125_v21 = vld [vmem:[%s1999_s6] ss:$0 sm:$0xff] }
  0x4f   : > { %1359 = vmatmul.mubr.f32.vlgmr.msra.gmra.mxu0 %v1662_v16  ;;  %1396 = vmatprep.subr.mxu0 %v639_v56 }
  0x50   : > { %1397 = vmatpush3.msra.mxu0 %v639_v56  ;;  %1391 = vmatprep.subr.mxu1 %v642_v23  ;;  %v819_v56 = vld [vmem:[%s1996_s3 + $0x148] sm:$0xff] }
  0x51   : > { %1398 = vmatprep.subr.mxu0 %v638_v58  ;;  %1392 = vmatpush3.msra.mxu1 %v642_v23 }
  0x52   : > { %1399 = vmatpush3.msra.mxu0 %v638_v58  ;;  %1431 = vmatprep.subr.mxu1 %v825_v25  ;;  %v818_v58 = vld [vmem:[%s1996_s3 + $0x140] sm:$0xff] }
  0x53   : > { %1400 = vmatprep.subr.mxu0 %v637_v60 }
  0x54   : > { %1401 = vmatpush3.msra.mxu0 %v637_v60  ;;  %v817_v60 = vld [vmem:[%s1996_s3 + $0x138] sm:$0xff] }
  0x55   : > { %1402 = vmatprep.subr.mxu0 %v636_v62 }
  0x56   : > { %1403 = vmatpush3.msra.mxu0 %v636_v62  ;;  %v816_v62 = vld [vmem:[%s1996_s3 + $0x130] sm:$0xff] }
  0x57   : > { %1404 = vmatprep.subr.mxu0 %v635_v0 }
  0x58   : > { %1405 = vmatpush3.msra.mxu0 %v635_v0  ;;  %v815_v0 = vld [vmem:[%s1996_s3 + $0x128] sm:$0xff] }
  0x59   : > { %1406 = vmatprep.subr.mxu0 %v634_v2 }
  0x5a   : > { %1407 = vmatpush3.msra.mxu0 %v634_v2  ;;  %v814_v2 = vld [vmem:[%s1996_s3 + $0x120] sm:$0xff] }
  0x5b   : > { %1408 = vmatprep.subr.mxu0 %v633_v4 }
  0x5c   : > { %1409 = vmatpush3.msra.mxu0 %v633_v4  ;;  %v813_v4 = vld [vmem:[%s1996_s3 + $0x118] sm:$0xff] }
  0x5d   : > { %1410 = vmatprep.subr.mxu0 %v632_v6 }
  0x5e   : > { %1411 = vmatpush3.msra.mxu0 %v632_v6  ;;  %v812_v6 = vld [vmem:[%s1996_s3 + $0x110] sm:$0xff] }
  0x5f   : > { %1412 = vmatprep.subr.mxu0 %v631_v8 }
  0x60   : > { %1413 = vmatpush3.msra.mxu0 %v631_v8  ;;  %v811_v8 = vld [vmem:[%s1996_s3 + $0x108] sm:$0xff] }
  0x61   : > { %1414 = vmatprep.subr.mxu0 %v630_v10 }
  0x62   : > { %1415 = vmatpush3.msra.mxu0 %v630_v10  ;;  %v810_v10 = vld [vmem:[%s1996_s3 + $0x100] sm:$0xff] }
  0x63   : > { %1416 = vmatprep.subr.mxu0 %v629_v12 }
  0x64   : > { %1417 = vmatpush3.msra.mxu0 %v629_v12 }
  0x65   : > { %1418 = vmatprep.subr.mxu0 %v628_v14 }
  0x66   : > { %1419 = vmatpush3.msra.mxu0 %v628_v14 }
  0x67   : > { %1420 = vmatprep.subr.mxu0 %v627_v18 }
  0x68   : > { %1421 = vmatpush3.msra.mxu0 %v627_v18 }
  0x69   : > { %1422 = vmatprep.subr.mxu0 %v626_v20 }
  0x6a   : > { %1423 = vmatpush3.msra.mxu0 %v626_v20  ;;  %v1124_v20 = vld [vmem:[%s1997_s4] ss:$0 sm:$0xff] }
  0x6b   : > { %1424 = vmatprep.subr.mxu0 %v625_v22 }
  0x6c   : > { %1425 = vmatpush3.msra.mxu0 %v625_v22 }
  0x6d   : > { %1426 = vmatprep.subr.mxu0 %v624_v24 }
  0x6e   : > { %1427 = vmatpush3.msra.mxu0 %v624_v24 }
  0x6f   : > { %1466 = vmatprep.subr.mxu0 %v929_v26 }
  0xee   : > { %v1290_v27 = vpop.f32.mrf.mxu0 }
  0xef   : > { %v1325_v28 = vpop.f32.mrf.mxu1 }
  0xf0   : > { %v430_v29 = vpop.f32.mrf.mxu0  ;;  %v511_v31 = vadd.f32 %v1325_v28, %v1290_v27 }
  0xf1   : > { %v505_v30 = vpop.f32.mrf.mxu1 }
  0xf2   : > { %v506_v34 = vadd.f32 %v505_v30, %v430_v29 }
 0x10f   : > { %v1360_v32 = vpop.f32.mrf.mxu0 }
 0x110   : > { %v608_v35 = vadd.f32 %v1360_v32, %v511_v31 }
 0x111   : > { %v598_v36 = vpop.f32.mrf.mxu0 }
 0x112   : > { %v1874_v37 = vadd.f32 %v1123_v33, %v608_v35  ;;  %v607_v38 = vadd.f32 %v598_v36, %v506_v34 }
 0x114   : > { %v619_v39 = vmax.f32 %v1874_v37, 0.0  ;;  %v616_v40 = vadd.f32 %v1123_v33, %v607_v38 }
 0x116   : > { %621 = vst [vmem:[#allocation3 + $0x10] sm:$0xff] %v619_v39  ;;  %v618_v41 = vmax.f32 %v616_v40, 0.0 }
 0x118   : > { %620 = vst [vmem:[#allocation3 + $0x8] sm:$0xff] %v618_v41 }
 0x11f   : > { %v640_v42 = vld [vmem:[#allocation3 + $0x6] sm:$0xff]  ;;  %v641_v44 = vld [vmem:[#allocation3 + $0xe] sm:$0xff] }
 0x120   : > { %v622_v43 = vld [vmem:[#allocation3 + $0x4] sm:$0xff]  ;;  %1393 = vmatprep.mubr.f32.mxu1 %v640_v42  ;;  %v623_v45 = vld [vmem:[#allocation3 + $0xc] sm:$0xff] }
 0x121   : > { %1428 = vmatprep.mubr.f32.mxu0 %v622_v43  ;;  %1394 = vmatmul.mubr.f32.vlgmr.msra.gmra.mxu1 %v641_v44 }
 0x122   : > { %1429 = vmatmul.mubr.f32.vlgmr.msra.gmra.mxu0 %v623_v45  ;;  %1432 = vmatpush3.msra.mxu1 %v825_v25 }
 0x123   : > { %1463 = vmatprep.mubr.f32.mxu1 %v618_v41  ;;  %1433 = vmatprep.subr.mxu1 %v824_v46 }
 0x124   : > { %1467 = vmatpush3.msra.mxu0 %v929_v26  ;;  %1434 = vmatpush3.msra.mxu1 %v824_v46 }
 0x125   : > { %1468 = vmatprep.subr.mxu0 %v928_v47  ;;  %1435 = vmatprep.subr.mxu1 %v823_v48 }
 0x126   : > { %1469 = vmatpush3.msra.mxu0 %v928_v47  ;;  %1436 = vmatpush3.msra.mxu1 %v823_v48 }
 0x127   : > { %1470 = vmatprep.subr.mxu0 %v927_v49  ;;  %1437 = vmatprep.subr.mxu1 %v822_v50 }
 0x128   : > { %1471 = vmatpush3.msra.mxu0 %v927_v49  ;;  %1438 = vmatpush3.msra.mxu1 %v822_v50 }
 0x129   : > { %1472 = vmatprep.subr.mxu0 %v926_v51  ;;  %1439 = vmatprep.subr.mxu1 %v821_v52 }
 0x12a   : > { %1473 = vmatpush3.msra.mxu0 %v926_v51  ;;  %1440 = vmatpush3.msra.mxu1 %v821_v52 }
 0x12b   : > { %1474 = vmatprep.subr.mxu0 %v925_v53  ;;  %1441 = vmatprep.subr.mxu1 %v820_v54 }
 0x12c   : > { %1475 = vmatpush3.msra.mxu0 %v925_v53  ;;  %1442 = vmatpush3.msra.mxu1 %v820_v54 }
 0x12d   : > { %1476 = vmatprep.subr.mxu0 %v924_v55  ;;  %1443 = vmatprep.subr.mxu1 %v819_v56 }
 0x12e   : > { %1477 = vmatpush3.msra.mxu0 %v924_v55  ;;  %1444 = vmatpush3.msra.mxu1 %v819_v56 }
 0x12f   : > { %1478 = vmatprep.subr.mxu0 %v923_v57  ;;  %1445 = vmatprep.subr.mxu1 %v818_v58 }
 0x130   : > { %1479 = vmatpush3.msra.mxu0 %v923_v57  ;;  %1446 = vmatpush3.msra.mxu1 %v818_v58 }
 0x131   : > { %1480 = vmatprep.subr.mxu0 %v922_v59  ;;  %1447 = vmatprep.subr.mxu1 %v817_v60 }
 0x132   : > { %1481 = vmatpush3.msra.mxu0 %v922_v59  ;;  %1448 = vmatpush3.msra.mxu1 %v817_v60 }
 0x133   : > { %1482 = vmatprep.subr.mxu0 %v921_v61  ;;  %1449 = vmatprep.subr.mxu1 %v816_v62 }
 0x134   : > { %1483 = vmatpush3.msra.mxu0 %v921_v61  ;;  %1450 = vmatpush3.msra.mxu1 %v816_v62 }
 0x135   : > { %1484 = vmatprep.subr.mxu0 %v920_v63  ;;  %1451 = vmatprep.subr.mxu1 %v815_v0 }
 0x136   : > { %1485 = vmatpush3.msra.mxu0 %v920_v63  ;;  %1452 = vmatpush3.msra.mxu1 %v815_v0 }
 0x137   : > { %1486 = vmatprep.subr.mxu0 %v919_v1  ;;  %1453 = vmatprep.subr.mxu1 %v814_v2 }
 0x138   : > { %1487 = vmatpush3.msra.mxu0 %v919_v1  ;;  %1454 = vmatpush3.msra.mxu1 %v814_v2 }
 0x139   : > { %1488 = vmatprep.subr.mxu0 %v918_v3  ;;  %1455 = vmatprep.subr.mxu1 %v813_v4 }
 0x13a   : > { %1489 = vmatpush3.msra.mxu0 %v918_v3  ;;  %1456 = vmatpush3.msra.mxu1 %v813_v4 }
 0x13b   : > { %1490 = vmatprep.subr.mxu0 %v917_v5  ;;  %1457 = vmatprep.subr.mxu1 %v812_v6 }
 0x13c   : > { %1491 = vmatpush3.msra.mxu0 %v917_v5  ;;  %1458 = vmatpush3.msra.mxu1 %v812_v6 }
 0x13d   : > { %1492 = vmatprep.subr.mxu0 %v916_v7  ;;  %1459 = vmatprep.subr.mxu1 %v811_v8 }
 0x13e   : > { %1493 = vmatpush3.msra.mxu0 %v916_v7  ;;  %1460 = vmatpush3.msra.mxu1 %v811_v8 }
 0x13f   : > { %1494 = vmatprep.subr.mxu0 %v915_v9  ;;  %1461 = vmatprep.subr.mxu1 %v810_v10 }
 0x140   : > { %1495 = vmatpush3.msra.mxu0 %v915_v9  ;;  %1462 = vmatpush3.msra.mxu1 %v810_v10 }
 0x141   : > { %1496 = vmatprep.subr.mxu0 %v914_v11  ;;  %1464 = vmatmul.mubr.f32.vlgmr.msra.gmra.mxu1 %v619_v39 }
 0x142   : > { %1497 = vmatpush3.msra.mxu0 %v914_v11  ;;  %1498 = vmatprep.mubr.f32.mxu0 %v1659_v15 }
 0x143   : > { %1499 = vmatmul.mubr.f32.vlgmr.msra.gmra.mxu0 %v1662_v16 }
 0x1e1   : > { %v1395_v12 = vpop.f32.mrf.mxu1 }
 0x1e2   : > { %v1430_v13 = vpop.f32.mrf.mxu0 }
 0x1e3   : > { %v724_v14 = vpop.f32.mrf.mxu1  ;;  %v805_v18 = vadd.f32 %v1430_v13, %v1395_v12 }
 0x1e4   : > { %v799_v17 = vpop.f32.mrf.mxu0 }
 0x1e5   : > { %v800_v22 = vadd.f32 %v799_v17, %v724_v14 }
 0x201   : > { %v1465_v19 = vpop.f32.mrf.mxu1 }
 0x202   : > { %v902_v23 = vadd.f32 %v1465_v19, %v805_v18 }
 0x203   : > { %v892_v15 = vpop.f32.mrf.mxu1  ;;  %v1500_v24 = vpop.f32.mrf.mxu0 }
 0x204   : > { %v911_v16 = vadd.f32 %v1124_v20, %v902_v23  ;;  %v901_v25 = vadd.f32 %v892_v15, %v800_v22  ;;  %v1009_v26 = vadd.f32 %v1500_v24, %v1125_v21 }
 0x205   : > { %v1003_v27 = vpop.f32.mrf.mxu0 }
 0x206   : > { %v913_v28 = vmax.f32 %v911_v16, 0.0  ;;  %v910_v29 = vadd.f32 %v1124_v20, %v901_v25  ;;  %v1004_v32 = vadd.f32 %v1125_v21, %v1003_v27 }
 0x208   : > { %v912_v30 = vmax.f32 %v910_v29, 0.0  ;;  %v1013_v31 = vadd.f32 %v1009_v26, %v913_v28 }
 0x20a   : > { %v1015_v33 = vmax.f32 %v1013_v31, 0.0  ;;  %v1012_v34 = vadd.f32 %v1004_v32, %v912_v30 }
 0x20c   : > { %1017 = vst [vmem:[%s316_s29 + $0x8] sm:$0xff] %v1015_v33  ;;  %v1014_v35 = vmax.f32 %v1012_v34, 0.0 }
 0x20e   : > { %1016 = vst [vmem:[%s316_s29] sm:$0xff] %v1014_v35 }
 0x20f PF: > { %s17_s26 = sadd.s32 1, %s1548_s26   ;;  %s2001_s24 = smov %s1544_s25 }
 0x210   : > { %p14_p5 = scmp.ge.s32.totalorder %s17_s26, 4   ;;  %s2002_s25 = smov %s2004_s27 }
 0x212   :  { %16 = sbr.rel (!%p14_p5) target bundleno = 2 (0x2), region = 86 }

</bundles_post_ra>
